<compile_context>
chip_gen: v7x
topology: tpu7x:2x2x1
jax: 0.10.0
libtpu: 0.0.40
codegen_flags: <defaults>
</compile_context>

<pallas_src>
import jax
import jax.numpy as jnp
from jax.experimental import pallas as pl
from jax.experimental.pallas import tpu as pltpu


# ----------------------------------------------------------------------------
# helpers
# ----------------------------------------------------------------------------
def _round_up(x, m):
    return ((x + m - 1) // m) * m


def _vmem_limit_bytes():
    """Chip-aware scoped-VMEM limit (85% of capacity, capped)."""
    try:
        cap = int(pltpu.get_tpu_info().vmem_capacity_bytes)
    except Exception:
        cap = 64 << 20  # conservative (v7x per-TC VMEM)
    return min(int(cap * 0.85), 100 << 20)


def _derive_time_block(T, B_pad, H_pad, vmem_limit, max_blk=64):
    """Pick the time block for the recurrence from the VMEM budget."""
    bpe = 2  # bf16
    fixed = 2 * (2 * H_pad * 4 * H_pad) * bpe      # W_hh both dirs, dbl-buffered
    fixed += 4 * B_pad * H_pad * 4                 # h/c f32 scratch (both dirs)
    per_t = 2 * (2 * B_pad * 4 * H_pad) * bpe      # gx slab, dbl-buffered
    per_t += 2 * (2 * B_pad * H_pad) * bpe         # y slab, dbl-buffered
    budget = int(vmem_limit * 0.6) - fixed
    blk = max(1, min(max_blk, budget // max(per_t, 1), T))
    n_blocks = -(-T // blk)
    blk = -(-T // n_blocks)                        # even out blocks, minimal pad
    return int(blk)


# ----------------------------------------------------------------------------
# Kernel 1: hoisted input projection  gates_x = X @ W_ih + b  (both directions)
# ----------------------------------------------------------------------------
def _proj_kernel(x_ref, w_ref, b_ref, o_ref):
    acc = jnp.dot(x_ref[...], w_ref[...], preferred_element_type=jnp.float32)
    o_ref[...] = (acc + b_ref[...]).astype(o_ref.dtype)


def input_projection(x2, w_stack, b_stack, *, vmem_limit, row_tile=512):
    """x2: (2,N,E) bf16; w_stack: (2,E,4Hp) bf16; b_stack: (2,1,4Hp) f32."""
    D, N, E = x2.shape
    G = w_stack.shape[2]
    RT = min(row_tile, N)                          # N is a multiple of 8
    return pl.pallas_call(
        _proj_kernel,
        out_shape=jax.ShapeDtypeStruct((D, N, G), jnp.bfloat16),
        grid_spec=pltpu.PrefetchScalarGridSpec(
            num_scalar_prefetch=0,
            grid=(D, pl.cdiv(N, RT)),
            in_specs=[
                pl.BlockSpec((None, RT, E), lambda d, r: (d, r, 0)),
                pl.BlockSpec((None, E, G), lambda d, r: (d, 0, 0)),
                pl.BlockSpec((None, 1, G), lambda d, r: (d, 0, 0)),
            ],
            out_specs=pl.BlockSpec((None, RT, G), lambda d, r: (d, r, 0)),
        ),
        compiler_params=pltpu.CompilerParams(
            dimension_semantics=("parallel", "parallel"),
            vmem_limit_bytes=vmem_limit),
    )(x2, w_stack, b_stack)


# ----------------------------------------------------------------------------
# Kernel 2: fused bidirectional LSTM recurrence (precomputed input gates).
# Single "arbitrary" time-block grid axis; both directions interleaved per
# step; h/c carried in the fori_loop carry, flushed to VMEM scratch at block
# boundaries; length masking folded into the y store.
# ----------------------------------------------------------------------------
def _bilstm_kernel(len_ref, gx_ref, whh_ref, y_ref, hc_scr):
    tb = pl.program_id(0)

    @pl.when(tb == 0)
    def _():
        hc_scr[...] = jnp.zeros_like(hc_scr)

    T_blk = gx_ref.shape[1]
    H = hc_scr.shape[-1]
    lengths = len_ref[...]                                  # (B, 1) int32
    w_hh_f = whh_ref[0]                                     # (Hp, 4Hp) bf16
    w_hh_b = whh_ref[1]
    t0 = tb * T_blk

    def sigm(x):                                            # 1 EUP op per gate
        return 0.5 * jnp.tanh(0.5 * x) + 0.5

    def cell(g, c):                                         # g: (B, 4Hp) f32
        i_g = sigm(g[:, 0:H])
        f_g = sigm(g[:, H:2 * H])
        g_g = jnp.tanh(g[:, 2 * H:3 * H])
        o_g = sigm(g[:, 3 * H:4 * H])
        c_new = f_g * c + i_g * g_g
        h_new = o_g * jnp.tanh(c_new)
        return h_new, c_new

    def step(t, carry):
        hf, cf, hb, cb = carry
        gf = gx_ref[0, t].astype(jnp.float32) + jnp.dot(
            hf.astype(jnp.bfloat16), w_hh_f, preferred_element_type=jnp.float32)
        gb = gx_ref[1, t].astype(jnp.float32) + jnp.dot(
            hb.astype(jnp.bfloat16), w_hh_b, preferred_element_type=jnp.float32)
        hf, cf = cell(gf, cf)
        hb, cb = cell(gb, cb)
        valid = ((t0 + t) < lengths).astype(jnp.float32)    # (B, 1)
        y_ref[0, t] = (hf * valid).astype(y_ref.dtype)
        y_ref[1, t] = (hb * valid).astype(y_ref.dtype)
        return hf, cf, hb, cb

    carry0 = (hc_scr[0], hc_scr[1], hc_scr[2], hc_scr[3])
    hf, cf, hb, cb = jax.lax.fori_loop(0, T_blk, step, carry0, unroll=4)
    hc_scr[0] = hf
    hc_scr[1] = cf
    hc_scr[2] = hb
    hc_scr[3] = cb


def bilstm_recurrence(gx, w_hh_stack, lengths_col, t_blk, *, vmem_limit):
    """gx: (2,Tp,Bp,4Hp) bf16; w_hh_stack: (2,Hp,4Hp) bf16; lengths_col: (Bp,1)."""
    D, T, B, G = gx.shape
    H = w_hh_stack.shape[1]
    assert T % t_blk == 0
    return pl.pallas_call(
        _bilstm_kernel,
        out_shape=jax.ShapeDtypeStruct((D, T, B, H), jnp.bfloat16),
        grid_spec=pltpu.PrefetchScalarGridSpec(
            num_scalar_prefetch=0,
            grid=(T // t_blk,),
            in_specs=[
                pl.BlockSpec((B, 1), lambda tb: (0, 0)),
                pl.BlockSpec((D, t_blk, B, G), lambda tb: (0, tb, 0, 0)),
                pl.BlockSpec((D, H, G), lambda tb: (0, 0, 0)),
            ],
            out_specs=pl.BlockSpec((D, t_blk, B, H), lambda tb: (0, tb, 0, 0)),
            scratch_shapes=[pltpu.VMEM((4, B, H), jnp.float32)],
        ),
        compiler_params=pltpu.CompilerParams(
            # Time must stay "arbitrary": h/c persist in VMEM scratch across
            # time blocks (init gated on tb == 0).
            dimension_semantics=("arbitrary",),
            vmem_limit_bytes=vmem_limit),
    )(lengths_col, gx, w_hh_stack)


# ----------------------------------------------------------------------------
# Kernel 3: output head. logits = yf @ W_top + yb @ W_bot + b, log_softmax
# over the (128-padded) class dim. Row-tiled, lane-dense output store.
# ----------------------------------------------------------------------------
def _head_kernel(xf_ref, xb_ref, wf_ref, wb_ref, b_ref, o_ref):
    logits = (jnp.dot(xf_ref[...], wf_ref[...], preferred_element_type=jnp.float32)
              + jnp.dot(xb_ref[...], wb_ref[...], preferred_element_type=jnp.float32)
              + b_ref[...])
    m = jnp.max(logits, axis=-1, keepdims=True)
    z = logits - m
    lse = jnp.log(jnp.sum(jnp.exp(z), axis=-1, keepdims=True))
    o_ref[...] = (z - lse).astype(o_ref.dtype)


def head_log_softmax(xf, xb, wf_t, wb_t, b, *, vmem_limit, row_tile=512):
    """xf/xb: (N,Hp) bf16; wf_t/wb_t: (Hp,Op) bf16; b: (1,Op) f32 -> (N,Op) f32."""
    N, H = xf.shape
    O = wf_t.shape[1]
    RT = min(row_tile, N)
    return pl.pallas_call(
        _head_kernel,
        out_shape=jax.ShapeDtypeStruct((N, O), jnp.float32),
        grid_spec=pltpu.PrefetchScalarGridSpec(
            num_scalar_prefetch=0,
            grid=(pl.cdiv(N, RT),),
            in_specs=[
                pl.BlockSpec((RT, H), lambda i: (i, 0)),
                pl.BlockSpec((RT, H), lambda i: (i, 0)),
                pl.BlockSpec((H, O), lambda i: (0, 0)),
                pl.BlockSpec((H, O), lambda i: (0, 0)),
                pl.BlockSpec((1, O), lambda i: (0, 0)),
            ],
            out_specs=pl.BlockSpec((RT, O), lambda i: (i, 0)),
        ),
        compiler_params=pltpu.CompilerParams(
            dimension_semantics=("parallel",),
            vmem_limit_bytes=vmem_limit),
    )(xf, xb, wf_t, wb_t, b)


# ----------------------------------------------------------------------------
# Full forward pass. pack_padded_sequence semantics: per-sequence reversal for
# the backward direction; padded positions zeroed by the in-kernel length mask
# (matching pad_packed_sequence output).
# ----------------------------------------------------------------------------
def sequence_tagger_forward(params, inputs, lengths, out_size):
    """inputs: (T, B) int32 token ids (0 = pad); lengths: (B,) int32."""
    T, B = inputs.shape
    E = params["embedding"].shape[1]
    H_pad = params["w_hh_stack"].shape[1]
    O_pad = params["w_out_f_t"].shape[1]

    vmem_limit = _vmem_limit_bytes()
    B_pad = _round_up(B, 8)                           # sublane alignment
    t_blk = _derive_time_block(T, B_pad, H_pad, vmem_limit)
    T_pad = _round_up(T, t_blk)

    # Embedding lookup stays in XLA (dynamic row gather).
    emb = params["embedding"][inputs]                                 # (T,B,E)

    emb_p = jnp.zeros((T_pad, B_pad, E), jnp.float32).at[:T, :B].set(emb)
    len_p = jnp.zeros((B_pad,), jnp.int32).at[:B].set(lengths.astype(jnp.int32))

    # Backward direction: reverse the valid prefix per sequence (identity past
    # length; those positions are zero-masked in-kernel). No gather for fwd.
    s = jnp.arange(T_pad)[:, None]
    rev_idx = jnp.where(s < len_p[None, :], len_p[None, :] - 1 - s, s)
    bidx = jnp.arange(B_pad)[None, :]
    emb_rev = emb_p[rev_idx, bidx]                                    # (Tp,Bp,E)

    x_stack = jnp.stack([emb_p, emb_rev]).astype(jnp.bfloat16)        # (2,Tp,Bp,E)

    N = T_pad * B_pad
    gx = input_projection(x_stack.reshape(2, N, E),
                          params["w_ih_stack"], params["b_stack"],
                          vmem_limit=vmem_limit)
    gx = gx.reshape(2, T_pad, B_pad, 4 * H_pad)

    y = bilstm_recurrence(gx, params["w_hh_stack"],
                          len_p.reshape(B_pad, 1), t_blk,
                          vmem_limit=vmem_limit)
    y_fwd = y[0]                                                      # (Tp,Bp,Hp)
    y_bwd = y[1][rev_idx, bidx]                                       # un-reverse

    logp = head_log_softmax(y_fwd.reshape(N, H_pad), y_bwd.reshape(N, H_pad),
                            params["w_out_f_t"], params["w_out_b_t"],
                            params["b_out"], vmem_limit=vmem_limit)
    logp = logp.reshape(T_pad, B_pad, O_pad)[:T, :B, :out_size]
    return logp.reshape(T * B, out_size)


# ----------------------------------------------------------------------------
# Parameter prep: pad H -> multiple of 128 (per-gate), O -> 128, transpose to
# (in, out) layout, stack over direction, cast matmul operands to bf16.
# ----------------------------------------------------------------------------
def _pad_gates(w, H, H_pad):
    parts = jnp.split(w, 4, axis=0)                       # i, f, g, o blocks
    parts = [jnp.pad(p, ((0, H_pad - H), (0, 0))) for p in parts]
    return jnp.concatenate(parts, axis=0)


def prepare_params(raw, hidden_dim, out_size):
    H = hidden_dim
    H_pad = _round_up(H, 128)
    O_pad = _round_up(out_size, 128)

    def prep_dir(w_ih, w_hh, b_ih, b_hh):
        w_ih_p = _pad_gates(w_ih, H, H_pad)                       # (4Hp, E)
        w_hh_p = _pad_gates(w_hh, H, H_pad)                       # (4Hp, H)
        w_hh_p = jnp.pad(w_hh_p, ((0, 0), (0, H_pad - H)))        # (4Hp, Hp)
        b = _pad_gates((b_ih + b_hh)[:, None], H, H_pad)[:, 0]    # (4Hp,)
        return w_ih_p.T, w_hh_p.T, b.reshape(1, 4 * H_pad)

    wi_f, wh_f, b_f = prep_dir(raw["w_ih_f"], raw["w_hh_f"],
                               raw["b_ih_f"], raw["b_hh_f"])
    wi_b, wh_b, b_b = prep_dir(raw["w_ih_b"], raw["w_hh_b"],
                               raw["b_ih_b"], raw["b_hh_b"])

    w_out = raw["w_out"]                                          # (O, 2H)
    wf_t = jnp.zeros((H_pad, O_pad), jnp.float32).at[:H, :out_size].set(w_out[:, :H].T)
    wb_t = jnp.zeros((H_pad, O_pad), jnp.float32).at[:H, :out_size].set(w_out[:, H:].T)
    # Padded class columns get -1e30 bias -> contribute ~0 to the softmax sum.
    b_out = jnp.full((1, O_pad), -1e30, jnp.float32).at[0, :out_size].set(raw["b_out"])

    return {
        "embedding": raw["embedding"].astype(jnp.float32),
        "w_ih_stack": jnp.stack([wi_f, wi_b]).astype(jnp.bfloat16),   # (2,E,4Hp)
        "w_hh_stack": jnp.stack([wh_f, wh_b]).astype(jnp.bfloat16),   # (2,Hp,4Hp)
        "b_stack": jnp.stack([b_f, b_b]).astype(jnp.float32),         # (2,1,4Hp)
        "w_out_f_t": wf_t.astype(jnp.bfloat16),                       # (Hp,Op)
        "w_out_b_t": wb_t.astype(jnp.bfloat16),                       # (Hp,Op)
        "b_out": b_out,                                               # (1,Op)
    }


# ----------------------------------------------------------------------------
# Pure-JAX f32 reference (lax.scan LSTM) for the correctness check.
# ----------------------------------------------------------------------------
def _ref_lstm(x, w_ih, w_hh, b, H):
    def step(carry, x_t):
        h, c = carry
        g = x_t @ w_ih.T + h @ w_hh.T + b
        i = jax.nn.sigmoid(g[:, :H])
        f = jax.nn.sigmoid(g[:, H:2 * H])
        gg = jnp.tanh(g[:, 2 * H:3 * H])
        o = jax.nn.sigmoid(g[:, 3 * H:])
        c = f * c + i * gg
        h = o * jnp.tanh(c)
        return (h, c), h

    B = x.shape[1]
    init = (jnp.zeros((B, H), jnp.float32), jnp.zeros((B, H), jnp.float32))
    _, ys = jax.lax.scan(step, init, x)
    return ys


def _ref_forward(raw, inputs, lengths):
    T, B = inputs.shape
    H = raw["w_hh_f"].shape[1]
    emb = raw["embedding"][inputs]
    mask = (jnp.arange(T)[:, None] < lengths[None, :]).astype(jnp.float32)
    y_fwd = _ref_lstm(emb, raw["w_ih_f"], raw["w_hh_f"],
                      raw["b_ih_f"] + raw["b_hh_f"], H) * mask[..., None]
    s = jnp.arange(T)[:, None]
    rev = jnp.where(s < lengths[None, :], lengths[None, :] - 1 - s, 0)
    bidx = jnp.arange(B)[None, :]
    x_rev = emb[rev, bidx] * mask[..., None]
    y_r = _ref_lstm(x_rev, raw["w_ih_b"], raw["w_hh_b"],
                    raw["b_ih_b"] + raw["b_hh_b"], H)
    y_bwd = y_r[rev, bidx] * mask[..., None]
    feats = jnp.concatenate([y_fwd, y_bwd], axis=-1).reshape(T * B, 2 * H)
    logits = feats @ raw["w_out"].T + raw["b_out"]
    return jax.nn.log_softmax(logits, axis=1)


# ----------------------------------------------------------------------------
def init_raw_params(key, vocab_size, embedding_dim, hidden_dim, out_size):
    ks = jax.random.split(key, 12)
    E, H = embedding_dim, hidden_dim

    def mk(k, shape):
        return 0.1 * jax.random.normal(k, shape, jnp.float32)

    emb = mk(ks[0], (vocab_size, E)).at[0].set(0.0)   # padding_idx=0
    raw = {
        "embedding": emb,
        "w_ih_f": mk(ks[1], (4 * H, E)), "w_hh_f": mk(ks[2], (4 * H, H)),
        "b_ih_f": mk(ks[3], (4 * H,)), "b_hh_f": mk(ks[4], (4 * H,)),
        "w_ih_b": mk(ks[5], (4 * H, E)), "w_hh_b": mk(ks[6], (4 * H, H)),
        "b_ih_b": mk(ks[7], (4 * H,)), "b_hh_b": mk(ks[8], (4 * H,)),
        "w_out": mk(ks[9], (out_size, 2 * H)),
        "b_out": mk(ks[10], (out_size,)),
    }
    return raw, ks[11]


if __name__ == "__main__":
    vocab_size, embedding_dim, hidden_dim, out_size = 50, 32, 32, 2
    T, B = 8, 2

    raw, data_key = init_raw_params(jax.random.PRNGKey(0), vocab_size,
                                    embedding_dim, hidden_dim, out_size)
    params = prepare_params(raw, hidden_dim, out_size)

    lengths = jnp.array([8, 5], dtype=jnp.int32)      # sorted descending (packed)
    inputs = jax.random.randint(data_key, (T, B), 1, vocab_size, dtype=jnp.int32)
    valid = jnp.arange(T)[:, None] < lengths[None, :]
    inputs = jnp.where(valid, inputs, 0).astype(jnp.int32)   # pad token = 0

    out = sequence_tagger_forward(params, inputs, lengths, out_size)
    out = jax.block_until_ready(out)
    assert out.shape == (T * B, out_size), out.shape

    ref = _ref_forward(raw, inputs, lengths)
    err = float(jnp.max(jnp.abs(out - ref)))
    # bf16 matmul operands (f32 accumulation/state) -> loosened tolerance.
    assert jnp.allclose(out, ref, atol=2e-2, rtol=2e-2), err

    print("KERNEL_OK")
</pallas_src>

<mosaic_0001>
module attributes {stable_mosaic.version = 11 : i64} {
  func.func @_proj_kernel(%arg0: i32, %arg1: i32, %arg2: memref<1x64x32xbf16, #tpu.memory_space<vmem>>, %arg3: memref<1x32x512xbf16, #tpu.memory_space<vmem>>, %arg4: memref<1x1x512xf32, #tpu.memory_space<vmem>>, %arg5: memref<1x64x512xbf16, #tpu.memory_space<vmem>>) attributes {dimension_semantics = [#tpu.dimension_semantics<parallel>, #tpu.dimension_semantics<parallel>], iteration_bounds = array<i64: 2, 1>, scalar_prefetch = 0 : i64, scratch_operands = 0 : i64, tpu.core_type = #tpu.core_type<tc>, window_params = [{transform_indices = @transform_0, window_bounds = array<i64: 1, 64, 32>}, {transform_indices = @transform_1, window_bounds = array<i64: 1, 32, 512>}, {transform_indices = @transform_2, window_bounds = array<i64: 1, 1, 512>}, {transform_indices = @transform_3, window_bounds = array<i64: 1, 64, 512>}]} {
    %c0 = arith.constant 0 : index
    %c0_0 = arith.constant 0 : index
    %c0_1 = arith.constant 0 : index
    %0 = vector.load %arg2[%c0, %c0_0, %c0_1] : memref<1x64x32xbf16, #tpu.memory_space<vmem>>, vector<1x64x32xbf16>
    %1 = vector.shape_cast %0 : vector<1x64x32xbf16> to vector<64x32xbf16>
    %c0_2 = arith.constant 0 : index
    %c0_3 = arith.constant 0 : index
    %c0_4 = arith.constant 0 : index
    %2 = vector.load %arg3[%c0_2, %c0_3, %c0_4] : memref<1x32x512xbf16, #tpu.memory_space<vmem>>, vector<1x32x512xbf16>
    %3 = vector.shape_cast %2 : vector<1x32x512xbf16> to vector<32x512xbf16>
    %cst = arith.constant dense<0.000000e+00> : vector<64x512xf32>
    %4 = tpu.matmul %1, %3, %cst {dimension_numbers = #tpu.dot_dimension_numbers<[1], [0], [0], [1], [0, 0, 1, 1], [], []>} : vector<64x32xbf16>, vector<32x512xbf16>, vector<64x512xf32> -> vector<64x512xf32>
    %c0_5 = arith.constant 0 : index
    %c0_6 = arith.constant 0 : index
    %c0_7 = arith.constant 0 : index
    %5 = vector.load %arg4[%c0_5, %c0_6, %c0_7] : memref<1x1x512xf32, #tpu.memory_space<vmem>>, vector<1x1x512xf32>
    %6 = vector.shape_cast %5 : vector<1x1x512xf32> to vector<1x512xf32>
    %7 = vector.broadcast %6 : vector<1x512xf32> to vector<64x512xf32>
    %8 = arith.addf %4, %7 : vector<64x512xf32>
    %9 = arith.truncf %8 : vector<64x512xf32> to vector<64x512xbf16>
    %c0_8 = arith.constant 0 : index
    %c0_9 = arith.constant 0 : index
    %c0_10 = arith.constant 0 : index
    %10 = vector.load %arg5[%c0_8, %c0_9, %c0_10] : memref<1x64x512xbf16, #tpu.memory_space<vmem>>, vector<1x64x512xbf16>
    %11 = vector.shape_cast %10 : vector<1x64x512xbf16> to vector<64x512xbf16>
    %12 = vector.shape_cast %9 : vector<64x512xbf16> to vector<1x64x512xbf16>
    tpu.vector_store %arg5[%c0_8, %c0_9, %c0_10], %12 {strides = array<i32>} : memref<1x64x512xbf16, #tpu.memory_space<vmem>>, vector<1x64x512xbf16>,
    return
  }
  func.func @transform_0(%arg0: i32, %arg1: i32) -> (i32, i32, i32) {
    %c0_i32 = arith.constant 0 : i32
    %c0_i32_0 = arith.constant 0 : i32
    return %arg0, %arg1, %c0_i32 : i32, i32, i32
  }
  func.func @transform_1(%arg0: i32, %arg1: i32) -> (i32, i32, i32) {
    %c0_i32 = arith.constant 0 : i32
    %c0_i32_0 = arith.constant 0 : i32
    %c0_i32_1 = arith.constant 0 : i32
    return %arg0, %c0_i32, %c0_i32_0 : i32, i32, i32
  }
  func.func @transform_2(%arg0: i32, %arg1: i32) -> (i32, i32, i32) {
    %c0_i32 = arith.constant 0 : i32
    %c0_i32_0 = arith.constant 0 : i32
    %c0_i32_1 = arith.constant 0 : i32
    return %arg0, %c0_i32, %c0_i32_0 : i32, i32, i32
  }
  func.func @transform_3(%arg0: i32, %arg1: i32) -> (i32, i32, i32) {
    %c0_i32 = arith.constant 0 : i32
    %c0_i32_0 = arith.constant 0 : i32
    return %arg0, %arg1, %c0_i32 : i32, i32, i32
  }
}

</mosaic_0001>

<bundles_post_ra>
// kernel: tpu_custom_call.1
= control target key start
LH: loop header
LB: loop body
LE: loop exit
PB: predicated region body
PF: predicated region fallthrough
CT: control target
= control target key end

     0   :  { %8 = vsyncpa [#allocation3], 0  ;;  %s1310_s0 = inlined_call_operand.vmem [shape: bf16[2,64,32], index: 0, kind: input, shape index: {}]   ;;  %s1311_s1 = inlined_call_operand.hbm [shape: bf16[2,32,512], index: 1, kind: input, shape index: {}]   ;;  %s1312_s2 = inlined_call_operand.vmem [shape: f32[2,1,512], index: 2, kind: input, shape index: {}]   ;;  %s1313_s3 = inlined_call_operand.hbm [shape: bf16[2,64,512], index: 3, kind: output, shape index: {}]  }
   0x1   :  { %10 = vsyncpa [#allocation3 + $0x1], 0 }
   0x2   :  { %11 = vsyncpa [#allocation4], 0 }
   0x3   :  { %13 = vsyncpa [#allocation4 + $0x1], 0  ;;  %s1055_s12 = smov 0   ;;  %s1057_s13 = smov 0  }
   0x4   :  { %s1059_s14 = smov 0   ;;  %s1061_s15 = smov 0  }
   0x5   :  { %s1063_s16 = smov 0   ;;  %s1065_s17 = smov 0  }
   0x6 LB: > { %s758_s18 = sadd.s32 4294967295, %s1026_s17   ;;  %s759_s19 = sadd.s32 4294967294, %s1026_s17   ;;  %s1026_s17 = sphi %s1065_s17, %s19_s17   ;;  %s1022_s16 = sphi %s1063_s16, %s1328_s16   ;;  %s1018_s15 = sphi %s1061_s15, %s1327_s15   ;;  %s1014_s14 = sphi %s1059_s14, %s1326_s14   ;;  %s1010_s13 = sphi %s1057_s13, %s1325_s13   ;;  %s1006_s12 = sphi %s1055_s12, %s1324_s12  }
   0x7   : > { %s31_s20 = sadd.s32 1, %s1022_s16  ;;  %s66_s21 = sadd.s32 1, %s1014_s14 }
   0x8   : > { %p33_p0 = scmp.ge.s32.totalorder %s31_s20, 2  ;;  %p73_p1 = scmp.ne.s32.totalorder %s1014_s14, %s1010_s13 }
   0x9   : > { %p74_p2 = scmp.eq.s32.totalorder %s1026_s17, 0  ;;  %p79_p3 = scmp.ne.s32.totalorder %s1010_s13, %s1006_s12 }
   0xa   : > { %s1330_s20 = smov (%p33_p0, %s31_s20), 0  ;;  %p80_p5 = scmp.eq.s32.totalorder %s758_s18, 0 }
   0xb   : > { %p1096_p4 = por %p74_p2, %p73_p1  ;;  %s63_s23 = ssub.s32 %s1022_s16, %s1330_s20 }
   0xc   : > { %p131_p6 = scmp.eq.s32.totalorder %s758_s18, 1  ;;  %p64_p7 = scmp.eq.s32.totalorder %s63_s23, 0 }
   0xd   : > { %p1102_p8 = por %p80_p5, %p79_p3  ;;  %p137_p10 = scmp.eq.s32.totalorder %s759_s19, 1 }
   0xe   : > { %p1106_p9 = por %p131_p6, %p73_p1  ;;  %p843_p13 = scmp.lt.s32.totalorder %s1026_s17, 2 }
   0xf   : > { %s1111_s26 = scalar_select %p64_p7, %s1014_s14, %s66_s21  }
  0x10   : > { %s1317_s25 = scalar_select %p1106_p9, 1, 0 }
  0x11   : > { %p1113_p11 = por %p137_p10, %p79_p3  ;;  %s170_s28 = sand.u32 1, %s1014_s14  }
  0x12   : > { %s762_s29 = sshll.u32 %s170_s28, 6  ;;  %s812_s30 = sshll.u32 %s1022_s16, 10 }
  0x13   : > { %s1318_s27 = scalar_select %p1113_p11, 1, 0 }
  0x14   : > { %s1124_s6 = scalar_lea.hbm %s1311_s1, %s812_s30  ;;  %s174_s7 = scalar_lea.vmem [#allocation2], %s762_s29 }
  0x15   : > { %s181_s8 = sshll.u32 %s174_s7, 4  ;;  %p1130_p0 = pnand %p843_p13, %p1096_p4  ;;  %s1126_s8 = int_to_ptr.vmem [resolvable:$true] %s181_s8 }
  0x16   : > { %s1135_s10 = scalar_lea.sflag [#allocation3], %s170_s28  ;;  %s914_s11 = scalar_lea.hbm %s1124_s6, 1024 }
  0x17   : > { %p915_p2 = scmp.ne.s32.totalorder %s1124_s6, %s914_s11  ;;  %p916_p3 = pneg %p1130_p0 }
  0x18   : > { %s919_s21 = scalar_lea.hbm %s1311_s1, 2048  ;;  %p920_p4 = scmp.lt.u32.totalorder %s1124_s6, %s1311_s1 }
  0x19   : > { %p917_p5 = pnand %p916_p3, %p915_p2  ;;  %p921_p7 = scmp.lt.u32.totalorder %s919_s21, %s914_s11 }
  0x1a   : > { %p923_p13 = scmp.lt.u32.totalorder %s914_s11, %s1124_s6 }
  0x1b   : > { %p918_p6 = pneg %p917_p5  ;;  %p922_p10 = por %p921_p7, %p920_p4 }
  0x1d   : > { %p924_p12 = por %p923_p13, %p922_p10 }
  0x1f   : > { %p925_p1 = pnand %p924_p12, %p918_p6 }
  0x21   : > { %928 = shalt.err (!%p925_p1)
}
  0x22   : > { %s929_s28 = scalar_lea.vmem %s1126_s8, 1024  ;;  %s1028_s29 = smov [#allocation2]  }
  0x23   : > { %p930_p2 = scmp.ne.s32.totalorder %s1126_s8, %s929_s28  ;;  %s934_s30 = sshll.u32 %s1028_s29, 4  ;;  %s935_s30 = int_to_ptr.vmem [resolvable:$false] %s934_s30 }
  0x24   : > { %s936_s4 = scalar_lea.vmem %s935_s30, 2048  ;;  %p937_p9 = scmp.lt.s32.totalorder %s1126_s8, %s935_s30 }
  0x25   : > { %p932_p5 = pnand %p930_p2, %p916_p3  ;;  %p938_p4 = scmp.lt.s32.totalorder %s936_s4, %s929_s28 }
  0x27   : > { %p933_p11 = pneg %p932_p5  ;;  %p939_p7 = por %p938_p4, %p937_p9 }
  0x29   : > { %p940_p10 = pnand %p939_p7, %p933_p11 }
  0x2b   : > { %943 = shalt.err (!%p940_p10)
}
  0x2c   : > { %s1029_s5 = smov 256   ;;  %s1030_s7 = smov 16  }
  0x2d   : > { %838 = dma.hbm_to_vmem [thread:$0]  (!%p1130_p0), %s1124_s6, 1024, %s1126_s8, %s1135_s10, %s1029_s5, %s1029_s5, %s1030_s7  }
  0x2e   : > { %p196_p12 = scmp.lt.s32.totalorder %s1026_s17, 3  ;;  %p1320_p1 = scmp.ge.s32.totalorder %s1026_s17, 1 }
  0x30   : > { %p197_p3 = pnand %p1320_p1, %p196_p12 }
  0x31   : > { %s1167_s11 = sand.u32 (!%p197_p3), 1, %s1010_s13  }
  0x32   : > { %200 = sbr.rel (%p197_p3) target bundleno = 326 (0x146), region = 32  ;;  %s766_s18 = sshll.u32 (!%p197_p3), %s1167_s11, 6 }
  0x33   : > { %s203_s19 = scalar_lea.sflag (!%p197_p3), [#allocation3], %s1167_s11  ;;  %s206_s21 = scalar_lea.vmem (!%p197_p3), [#allocation2], %s766_s18 }
  0x39   : > { %997 = dma.done.wait (%p1102_p8), %s203_s19, 1024  }
  0x3a   : > { %999 = vsyncadd (%p1102_p8), %s203_s19, 4294966272  ;;  %p243_p9 = scmp.lt.s32.totalorder %s1018_s15, 1  ;;  %v1031_v0 = vmov 0   ;;  %v898_v1 = vld [vmem:[%s206_s21 + $0x4] ss:$16 sps:$4 sm:$0xff]   ;;  %vm356_vm0 = vcmask 261120   ;;  %v276_v13 = vlaneseq }
  0x3b   : > { %401 = vmatprep.mubr.bf16.mxu0 %v1031_v0  ;;  %474 = vmatprep.mubr.bf16.mxu1 %v1031_v0  ;;  %v900_v2 = vld [vmem:[%s206_s21 + $0xc] ss:$16 sps:$4 sm:$0xff]   ;;  %v902_v3 = vld [vmem:[%s206_s21] ss:$16 sps:$4 sm:$0xff]   ;;  %v903_v4 = vld [vmem:[%s206_s21 + $0x8] ss:$16 sps:$4 sm:$0xff]  }
  0x3c   : > { %s1177_s6 = scalar_select %p243_p9, %s1018_s15, 1  ;;  %369 = vmatprep.subr.bf16.mxu0 %v898_v1  ;;  %442 = vmatprep.subr.bf16.mxu1 %v900_v2  ;;  %v904_v5 = vld [vmem:[%s206_s21 + $0x24] ss:$16 sps:$4 sm:$0xff]   ;;  %v906_v6 = vld [vmem:[%s206_s21 + $0x2c] ss:$16 sps:$4 sm:$0xff]   ;;  %v277_v14 = vshrl.u32 %v276_v13, 7 }
  0x3d   : > { %370 = vmatpush1.bf16.msra.mxu0 %v902_v3  ;;  %443 = vmatpush1.bf16.msra.mxu1 %v903_v4  ;;  %v908_v7 = vld [vmem:[%s206_s21 + $0x20] ss:$16 sps:$4 sm:$0xff]   ;;  %v909_v8 = vld [vmem:[%s206_s21 + $0x28] ss:$16 sps:$4 sm:$0xff]   ;;  %s767_s30 = sshll.u32 %s1167_s11, 7  ;;  %s830_s5 = sshll.u32 %s1018_s15, 11 }
  0x3e   : > { %s813_s8 = sshll.u32 %s1177_s6, 5  ;;  %371 = vmatprep.subr.bf16.mxu0 %v904_v5  ;;  %444 = vmatprep.subr.bf16.mxu1 %v906_v6  ;;  %s770_s22 = sshll.u32 %s1177_s6, 2  ;;  %v278_v15 = vsub.s32 0, %v277_v14  ;;  %v286_v16 = vsub.s32 2, %v277_v14  ;;  %v282_v18 = vsub.s32 1, %v277_v14  ;;  %v290_v19 = vsub.s32 3, %v277_v14 }
  0x3f   : > { %s250_s10 = scalar_lea.vmem %s1310_s0, %s813_s8  ;;  %s255_s29 = scalar_lea.vmem %s1312_s2, %s770_s22 }
  0x40   : > { %v910_v9 = vld [vmem:[%s250_s10] sm:$0xff]   ;;  %v911_v10 = vld [vmem:[%s250_s10 + $0x8] sm:$0xff]   ;;  %v912_v11 = vld [vmem:[%s250_s10 + $0x10] sm:$0xff]   ;;  %s1212_s4 = scalar_lea.vmem [#allocation5], %s767_s30  ;;  %s1255_s15 = scalar_lea.hbm %s1313_s3, %s830_s5 }
  0x41   : > { %372 = vmatpush1.bf16.msra.mxu0 %v908_v7  ;;  %445 = vmatpush1.bf16.msra.mxu1 %v909_v8  ;;  %v913_v12 = vld [vmem:[%s250_s10 + $0x18] sm:$0xff]   ;;  %v274_v17 = vld [vmem:[%s255_s29] sm:$0xf]  ;;  %s644_s7 = sshll.u32 %s1212_s4, 4  ;;  %s628_s21 = scalar_lea.sflag [#allocation4], %s1167_s11  ;;  %s1257_s7 = int_to_ptr.vmem [resolvable:$true] %s644_s7 }
  0x42   : > { %v1195_v20 = vrot.slane %v274_v17, %v278_v15  ;;  %v1197_v21 = vrot.slane %v274_v17, %v286_v16  ;;  %v1199_v22 = vrot.slane %v274_v17, %v282_v18  ;;  %v1201_v23 = vrot.slane %v274_v17, %v290_v19  ;;  %s944_s6 = scalar_lea.vmem %s1257_s7, 2048  ;;  %p1321_p11 = scmp.ne.s32.totalorder %s1317_s25, 0 }
  0x43   : > { %p945_p8 = scmp.ne.s32.totalorder %s1257_s7, %s944_s6  ;;  %s1032_s8 = smov [#allocation5]  }
  0x44   : > { %783 = vmatmul.mubr.msk.bf16.vlgmr.msra.gmra.mrb[0].mxu0 %vm356_vm0, %v910_v9  ;;  %787 = vmatmul.mubr.msk.bf16.vlgmr.msra.gmra.mrb[0].mxu1 %vm356_vm0, %v910_v9  ;;  %s948_s24 = sshll.u32 %s1032_s8, 4  ;;  %s949_s24 = int_to_ptr.vmem [resolvable:$false] %s948_s24 }
  0x45   : > { %411 = vmatprep.mubr.bf16.mxu0 %v1031_v0  ;;  %484 = vmatprep.mubr.bf16.mxu1 %v1031_v0  ;;  %p946_p0 = pnand %p945_p8, %p1321_p11  ;;  %s950_s9 = scalar_lea.vmem %s949_s24, 4096 }
  0x46   : > { %p951_p13 = scmp.lt.s32.totalorder %s1257_s7, %s949_s24  ;;  %p952_p2 = scmp.lt.s32.totalorder %s950_s9, %s944_s6 }
  0x47   : > { %p947_p6 = pneg %p946_p0 }
  0x48   : > { %p953_p5 = por %p952_p2, %p951_p13 }
  0x4a   : > { %p954_p4 = pnand %p953_p5, %p947_p6 }
  0x4c   : > { %784 = vmatmul.mubr.msk.bf16.gmra.mrb[4].mxu0 %vm356_vm0, %v911_v10  ;;  %788 = vmatmul.mubr.msk.bf16.gmra.mrb[4].mxu1 %vm356_vm0, %v911_v10 }
  0x4d   : > { %421 = vmatprep.mubr.bf16.mxu0 %v1031_v0  ;;  %494 = vmatprep.mubr.bf16.mxu1 %v1031_v0 }
  0x54   : > { %785 = vmatmul.mubr.msk.bf16.gmra.mrb[8].mxu0 %vm356_vm0, %v912_v11  ;;  %789 = vmatmul.mubr.msk.bf16.gmra.mrb[8].mxu1 %vm356_vm0, %v912_v11 }
  0x55   : > { %431 = vmatprep.mubr.bf16.mxu0 %v1031_v0  ;;  %504 = vmatprep.mubr.bf16.mxu1 %v1031_v0 }
  0x5c   : > { %786 = vmatmul.mubr.msk.bf16.gmra.mrb[12].mxu0 %vm356_vm0, %v913_v12  ;;  %790 = vmatmul.mubr.msk.bf16.gmra.mrb[12].mxu1 %vm356_vm0, %v913_v12 }
 0x117   : > { %v403_v24 = vpop.f32.mrb[0].mxu0  ;;  %v476_v25 = vpop.f32.mrb[0].mxu1 }
 0x118   : > { %v404_v26 = vadd.f32 %v403_v24, %v1195_v20  ;;  %v477_v27 = vadd.f32 %v476_v25, %v1197_v21  ;;  %v405_v28 = vpop.f32.mrb[1].mxu0  ;;  %v478_v29 = vpop.f32.mrb[1].mxu1 }
 0x119   : > { %v406_v30 = vadd.f32 %v405_v28, %v1199_v22  ;;  %v479_v31 = vadd.f32 %v478_v29, %v1201_v23  ;;  %v407_v32 = vpop.f32.mrb[2].mxu0  ;;  %v480_v33 = vpop.f32.mrb[2].mxu1 }
 0x11a   : > { %v408_v34 = vadd.f32 %v407_v32, %v1195_v20  ;;  %v481_v35 = vadd.f32 %v480_v33, %v1197_v21  ;;  %v409_v36 = vpop.f32.mrb[3].mxu0  ;;  %v482_v37 = vpop.f32.mrb[3].mxu1 }
 0x11b   : > { %v814_v38 = vpack.c.bf16 %v406_v30, %v404_v26  ;;  %v815_v39 = vpack.c.bf16 %v479_v31, %v477_v27  ;;  %v410_v40 = vadd.f32 %v409_v36, %v1199_v22  ;;  %v483_v41 = vadd.f32 %v482_v37, %v1201_v23 }
 0x11d   : > { %611 = vst [vmem:[%s1212_s4] sm:$0xff] %v814_v38  ;;  %612 = vst [vmem:[%s1212_s4 + $0x8] sm:$0xff] %v815_v39  ;;  %v816_v42 = vpack.c.bf16 %v410_v40, %v408_v34  ;;  %v817_v43 = vpack.c.bf16 %v483_v41, %v481_v35 }
 0x11f   : > { %613 = vst [vmem:[%s1212_s4 + $0x10] sm:$0xff] %v816_v42  ;;  %614 = vst [vmem:[%s1212_s4 + $0x18] sm:$0xff] %v817_v43  ;;  %v413_v44 = vpop.f32.mrb[4].mxu0  ;;  %v486_v45 = vpop.f32.mrb[4].mxu1 }
 0x120   : > { %v414_v46 = vadd.f32 %v413_v44, %v1195_v20  ;;  %v487_v47 = vadd.f32 %v486_v45, %v1197_v21  ;;  %v415_v48 = vpop.f32.mrb[5].mxu0  ;;  %v488_v49 = vpop.f32.mrb[5].mxu1 }
 0x121   : > { %v416_v50 = vadd.f32 %v415_v48, %v1199_v22  ;;  %v489_v51 = vadd.f32 %v488_v49, %v1201_v23  ;;  %v417_v52 = vpop.f32.mrb[6].mxu0  ;;  %v490_v53 = vpop.f32.mrb[6].mxu1 }
 0x122   : > { %v418_v54 = vadd.f32 %v417_v52, %v1195_v20  ;;  %v491_v55 = vadd.f32 %v490_v53, %v1197_v21  ;;  %v419_v56 = vpop.f32.mrb[7].mxu0  ;;  %v492_v57 = vpop.f32.mrb[7].mxu1 }
 0x123   : > { %v818_v58 = vpack.c.bf16 %v416_v50, %v414_v46  ;;  %v819_v59 = vpack.c.bf16 %v489_v51, %v487_v47  ;;  %v420_v60 = vadd.f32 %v419_v56, %v1199_v22  ;;  %v493_v61 = vadd.f32 %v492_v57, %v1201_v23 }
 0x125   : > { %615 = vst [vmem:[%s1212_s4 + $0x20] sm:$0xff] %v818_v58  ;;  %616 = vst [vmem:[%s1212_s4 + $0x28] sm:$0xff] %v819_v59  ;;  %v820_v62 = vpack.c.bf16 %v420_v60, %v418_v54  ;;  %v821_v63 = vpack.c.bf16 %v493_v61, %v491_v55 }
 0x127   : > { %617 = vst [vmem:[%s1212_s4 + $0x30] sm:$0xff] %v820_v62  ;;  %618 = vst [vmem:[%s1212_s4 + $0x38] sm:$0xff] %v821_v63  ;;  %v423_v0 = vpop.f32.mrb[8].mxu0  ;;  %v496_v1 = vpop.f32.mrb[8].mxu1 }
 0x128   : > { %v424_v2 = vadd.f32 %v423_v0, %v1195_v20  ;;  %v497_v3 = vadd.f32 %v496_v1, %v1197_v21  ;;  %v425_v4 = vpop.f32.mrb[9].mxu0  ;;  %v498_v5 = vpop.f32.mrb[9].mxu1 }
 0x129   : > { %v426_v6 = vadd.f32 %v425_v4, %v1199_v22  ;;  %v499_v7 = vadd.f32 %v498_v5, %v1201_v23  ;;  %v427_v8 = vpop.f32.mrb[10].mxu0  ;;  %v500_v9 = vpop.f32.mrb[10].mxu1 }
 0x12a   : > { %v428_v10 = vadd.f32 %v427_v8, %v1195_v20  ;;  %v501_v11 = vadd.f32 %v500_v9, %v1197_v21  ;;  %v429_v12 = vpop.f32.mrb[11].mxu0  ;;  %v502_v13 = vpop.f32.mrb[11].mxu1 }
 0x12b   : > { %v822_v14 = vpack.c.bf16 %v426_v6, %v424_v2  ;;  %v823_v15 = vpack.c.bf16 %v499_v7, %v497_v3  ;;  %v430_v16 = vadd.f32 %v429_v12, %v1199_v22  ;;  %v503_v17 = vadd.f32 %v502_v13, %v1201_v23 }
 0x12d   : > { %619 = vst [vmem:[%s1212_s4 + $0x40] sm:$0xff] %v822_v14  ;;  %620 = vst [vmem:[%s1212_s4 + $0x48] sm:$0xff] %v823_v15  ;;  %v824_v18 = vpack.c.bf16 %v430_v16, %v428_v10  ;;  %v825_v19 = vpack.c.bf16 %v503_v17, %v501_v11 }
 0x12f   : > { %621 = vst [vmem:[%s1212_s4 + $0x50] sm:$0xff] %v824_v18  ;;  %622 = vst [vmem:[%s1212_s4 + $0x58] sm:$0xff] %v825_v19  ;;  %v433_v24 = vpop.f32.mrb[12].mxu0  ;;  %v506_v25 = vpop.f32.mrb[12].mxu1 }
 0x130   : > { %v434_v26 = vadd.f32 %v433_v24, %v1195_v20  ;;  %v507_v27 = vadd.f32 %v506_v25, %v1197_v21  ;;  %v435_v28 = vpop.f32.mrb[13].mxu0  ;;  %v508_v29 = vpop.f32.mrb[13].mxu1 }
 0x131   : > { %v436_v30 = vadd.f32 %v435_v28, %v1199_v22  ;;  %v509_v31 = vadd.f32 %v508_v29, %v1201_v23  ;;  %v437_v32 = vpop.f32.mrb[14].mxu0  ;;  %v510_v33 = vpop.f32.mrb[14].mxu1 }
 0x132   : > { %v438_v34 = vadd.f32 %v437_v32, %v1195_v20  ;;  %v511_v35 = vadd.f32 %v510_v33, %v1197_v21  ;;  %v439_v36 = vpop.f32.mrb[15].mxu0  ;;  %v512_v37 = vpop.f32.mrb[15].mxu1 }
 0x133   : > { %v826_v38 = vpack.c.bf16 %v436_v30, %v434_v26  ;;  %v827_v39 = vpack.c.bf16 %v509_v31, %v507_v27  ;;  %v440_v40 = vadd.f32 %v439_v36, %v1199_v22  ;;  %v513_v41 = vadd.f32 %v512_v37, %v1201_v23 }
 0x135   : > { %623 = vst [vmem:[%s1212_s4 + $0x60] sm:$0xff] %v826_v38  ;;  %624 = vst [vmem:[%s1212_s4 + $0x68] sm:$0xff] %v827_v39  ;;  %v828_v20 = vpack.c.bf16 %v440_v40, %v438_v34  ;;  %v829_v21 = vpack.c.bf16 %v513_v41, %v511_v35 }
 0x137   : > { %625 = vst [vmem:[%s1212_s4 + $0x70] sm:$0xff] %v828_v20  ;;  %626 = vst [vmem:[%s1212_s4 + $0x78] sm:$0xff] %v829_v21 }
 0x138   : > { %957 = shalt.err (!%p954_p4)
}
 0x139   : > { %s958_s10 = scalar_lea.hbm %s1255_s15, 2048  ;;  %s962_s28 = scalar_lea.hbm %s1313_s3, 4096 }
 0x13a   : > { %p959_p7 = scmp.ne.s32.totalorder %s1255_s15, %s958_s10  ;;  %p963_p1 = scmp.lt.u32.totalorder %s1255_s15, %s1313_s3 }
 0x13b   : > { %p964_p3 = scmp.lt.u32.totalorder %s962_s28, %s958_s10  ;;  %p966_p8 = scmp.lt.u32.totalorder %s958_s10, %s1255_s15 }
 0x13c   : > { %p960_p10 = pnand %p959_p7, %p1321_p11 }
 0x13d   : > { %p965_p9 = por %p964_p3, %p963_p1 }
 0x13e   : > { %p961_p12 = pneg %p960_p10 }
 0x13f   : > { %p967_p0 = por %p966_p8, %p965_p9 }
 0x141   : > { %p968_p6 = pnand %p967_p0, %p961_p12 }
 0x143   : > { %971 = shalt.err (!%p968_p6)
}
 0x144   : > { %s1033_s4 = smov 256   ;;  %s1034_s5 = smov 16  }
 0x145   : > { %833 = dma.vmem_to_hbm [thread:$0]  (%p1321_p11), %s1257_s7, 2048, %s1255_s15, %s628_s21, %s1033_s4, %s1033_s4, %s1034_s5  }
 0x146 PF: > { %s659_s18 = sand.u32 1, %s1006_s12   ;;  %p1322_p13 = scmp.ne.s32.totalorder %s1318_s27, 0 }
 0x147   : > { %p1323_p2 = scmp.ge.s32.totalorder %s1026_s17, 2  ;;  %s660_s19 = scalar_lea.sflag [#allocation4], %s659_s18 }
 0x149   : > { %p840_p5 = pnand %p1323_p2, %p1322_p13 }
 0x14b   : > { %1001 = dma.done.wait (!%p840_p5), %s660_s19, 2048  }
 0x14c   : > { %1003 = vsyncadd (!%p840_p5), %s660_s19, 4294965248  ;;  %s19_s17 = sadd.s32 1, %s1026_s17   ;;  %s1324_s12 = smov %s1010_s13 }
 0x14d   : > { %p16_p4 = scmp.ge.s32.totalorder %s19_s17, 4   ;;  %s1325_s13 = smov %s1014_s14 }
 0x14e   : > { %s1326_s14 = smov %s1111_s26  ;;  %s1327_s15 = smov %s1022_s16 }
 0x14f   : > { %s1328_s16 = smov %s1330_s20  ;;  %18 = sbr.rel (!%p16_p4) target bundleno = 6 (0x6), region = 83 }
 0x156   :  { %665 = vsyncpa [#allocation3], 1 }
 0x157   :  { %667 = vsyncpa [#allocation3 + $0x1], 1 }
 0x158   :  { %668 = vsyncpa [#allocation4], 1 }
 0x159   :  { %670 = vsyncpa [#allocation4 + $0x1], 1 }

</bundles_post_ra>
